<compile_context>
chip_gen: v7x
topology: tpu7x:2x2x1
jax: 0.10.0
libtpu: 0.0.40
codegen_flags: <defaults>
</compile_context>

<pallas_src>
import jax
import jax.numpy as jnp
from jax.experimental import pallas as pl
from jax.experimental.pallas import tpu as pltpu

_MIB = 1024 * 1024


def _round_up(x, m):
    return ((x + m - 1) // m) * m


def _tpu_generation():
    try:
        kind = jax.devices()[0].device_kind.lower()
    except Exception:
        return "unknown"
    if "v5 lite" in kind or "v5e" in kind or "v5lite" in kind:
        return "v5e"
    if "v6" in kind:
        return "v6e"
    if "v7" in kind:
        return "v7x"
    return "unknown"


def _vmem_capacity_bytes(gen):
    try:
        return int(pltpu.get_tpu_info().vmem_capacity_bytes)
    except Exception:
        return {"v5e": 128 * _MIB, "v6e": 128 * _MIB, "v7x": 64 * _MIB}.get(
            gen, 64 * _MIB)


def _pick_tile_h(H, target):
    """Largest divisor of H that is <= target and a multiple of 128 (else H)."""
    if H <= target:
        return H
    best = None
    t = 128
    while t <= target:
        if H % t == 0:
            best = t
        t += 128
    return best if best is not None else H


def _swiglu_mlp_kernel(x_ref, wg_ref, wu_ref, wd_ref, o_ref, acc_ref):
    """One (M-tile, H-tile) step of the fused SwiGLU MLP.

    x_ref  : (tm, D)      activation tile (compute dtype)
    wg_ref : (D, th)      W_fc   columns for this H tile (gate)
    wu_ref : (D, th)      W_fc2  columns for this H tile (up, through silu)
    wd_ref : (th, D)      W_proj rows for this H tile (down)
    o_ref  : (tm, D)      output tile (written on the last H step)
    acc_ref: (tm, D) f32  VMEM accumulator, persists across H steps
    """
    h = pl.program_id(1)

    @pl.when(h == 0)
    def _init():
        acc_ref[...] = jnp.zeros_like(acc_ref)

    x = x_ref[...]
    # Gate / up projections for this H tile; MXU with f32 accumulation.
    x1 = jnp.dot(x, wg_ref[...], preferred_element_type=jnp.float32)
    x2 = jnp.dot(x, wu_ref[...], preferred_element_type=jnp.float32)
    g = x1 * (x2 * jax.nn.sigmoid(x2))  # x1 * silu(x2), in f32

    # Partial down projection for this H tile, accumulated in f32.
    acc_ref[...] += jnp.dot(g.astype(wd_ref.dtype), wd_ref[...],
                            preferred_element_type=jnp.float32)

    @pl.when(h == pl.num_programs(1) - 1)
    def _finalize():
        o_ref[...] = acc_ref[...].astype(o_ref.dtype)


def prepare_mlp_weights(w_fc, w_fc2, w_proj, compute_dtype=jnp.bfloat16):
    """Cast MLP weights once at parameter-init time (not per forward call)."""
    return (w_fc.astype(compute_dtype),
            w_fc2.astype(compute_dtype),
            w_proj.astype(compute_dtype))


def swiglu_mlp(x, w_fc, w_fc2, w_proj, *, tile_m=None, tile_h=None,
               compute_dtype=jnp.bfloat16, out_dtype=None):
    """LLaMA MLP forward:  ((x @ W_fc) * silu(x @ W_fc2)) @ W_proj.

    x      : (B, T, D)
    w_fc   : (D, H)   (== PyTorch c_fc.weight.T)
    w_fc2  : (D, H)   (== PyTorch c_fc2.weight.T)
    w_proj : (H, D)   (== PyTorch c_proj.weight.T)
    Returns (B, T, D) in out_dtype (default: x.dtype).
    """
    B, T, D = x.shape
    H = w_fc.shape[1]
    assert w_fc.shape == (D, H) and w_fc2.shape == (D, H)
    assert w_proj.shape == (H, D)

    out_dtype = out_dtype if out_dtype is not None else x.dtype
    M = B * T

    # ---- per-generation tiling / VMEM budget -----------------------------
    gen = _tpu_generation()
    cap = _vmem_capacity_bytes(gen)
    budget = int(cap * 0.80)          # fitting target for our working set
    vmem_limit = int(cap * 0.90)      # scoped limit passed to the compiler

    defaults = {
        "v5e": dict(tile_m=512, tile_h=1024, w_buf=3, m_align=128),
        "v6e": dict(tile_m=1024, tile_h=1024, w_buf=2, m_align=256),
        "v7x": dict(tile_m=512, tile_h=512, w_buf=2, m_align=256),
    }.get(gen, dict(tile_m=512, tile_h=512, w_buf=2, m_align=256))
    w_buf = defaults["w_buf"]

    tm = tile_m if tile_m is not None else defaults["tile_m"]
    th_target = tile_h if tile_h is not None else defaults["tile_h"]

    # Clamp M tile to the problem; keep sublane packing (>=16 for bf16) and
    # MXU-native alignment for large tiles.
    tm = max(8, min(tm, _round_up(M, 8)))
    if tm >= 32:
        tm = _round_up(tm, 16)
    if tile_m is None and M >= defaults["m_align"]:
        tm = max(defaults["m_align"], (tm // defaults["m_align"]) * defaults["m_align"])

    # H tile must divide H and be a multiple of 128 (lane-aligned).
    th = _pick_tile_h(H, th_target)

    # On v7x make sure the parallel M axis exposes >=2 programs (2 TCs/chip).
    if gen == "v7x" and pl.cdiv(M, tm) < 2 and M >= 512:
        tm = _round_up(pl.cdiv(M, 2), 256)

    # ---- fit tiles to the VMEM budget ------------------------------------
    csz = jnp.dtype(compute_dtype).itemsize
    osz = jnp.dtype(out_dtype).itemsize

    def _est(tm_, th_):
        return (2 * tm_ * D * csz              # x tile (double-buffered)
                + 2 * w_buf * D * th_ * csz    # W_fc + W_fc2 tiles
                + w_buf * th_ * D * csz        # W_proj tile
                + 2 * tm_ * D * osz            # out tile
                + tm_ * D * 4                  # f32 accumulator scratch
                + 3 * tm_ * th_ * 4)           # x1 / x2 / g f32 temporaries

    while _est(tm, th) > budget:
        new_th = _pick_tile_h(H, th - 128) if th > 128 else th
        if new_th < th:
            th = new_th
        elif tm > 256:
            tm = max(256, tm // 2)
        elif tm > 8:
            tm = max(8, tm // 2)
        else:
            break

    grid_m = pl.cdiv(M, tm)          # ragged M handled by boundary masking
    grid_h = H // th

    # ---- dtype plumbing (no per-call copies when already prepared) -------
    x2d = x.reshape(M, D)
    if x2d.dtype != compute_dtype:
        # One extra HBM pass; producers should feed compute-dtype activations.
        x2d = x2d.astype(compute_dtype)
    wg = w_fc if w_fc.dtype == compute_dtype else w_fc.astype(compute_dtype)
    wu = w_fc2 if w_fc2.dtype == compute_dtype else w_fc2.astype(compute_dtype)
    wd = w_proj if w_proj.dtype == compute_dtype else w_proj.astype(compute_dtype)

    def _weight_spec(shape, idx_map):
        if w_buf != 2:
            # Deeper buffering on the big weight streams (v5e: hide DMA latency).
            return pl.BlockSpec(shape, idx_map, pipeline_mode=pl.Buffered(w_buf))
        return pl.BlockSpec(shape, idx_map)

    out2d = pl.pallas_call(
        _swiglu_mlp_kernel,
        out_shape=jax.ShapeDtypeStruct((M, D), out_dtype),
        grid_spec=pltpu.PrefetchScalarGridSpec(
            num_scalar_prefetch=0,
            grid=(grid_m, grid_h),
            in_specs=[
                pl.BlockSpec((tm, D), lambda i, h: (i, 0)),    # x
                _weight_spec((D, th), lambda i, h: (0, h)),    # W_fc   (gate)
                _weight_spec((D, th), lambda i, h: (0, h)),    # W_fc2  (up)
                _weight_spec((th, D), lambda i, h: (h, 0)),    # W_proj (down)
            ],
            out_specs=pl.BlockSpec((tm, D), lambda i, h: (i, 0)),
            scratch_shapes=[pltpu.VMEM((tm, D), jnp.float32)],
        ),
        compiler_params=pltpu.CompilerParams(
            dimension_semantics=("parallel", "arbitrary"),
            vmem_limit_bytes=vmem_limit),
    )(x2d, wg, wu, wd)

    return out2d.reshape(B, T, D)


def _llama_hidden_dim(n_embd, multiple_of, ffn_dim_multiplier=None):
    hidden_dim = 4 * n_embd
    hidden_dim = int(2 * hidden_dim / 3)
    if ffn_dim_multiplier is not None:
        hidden_dim = int(ffn_dim_multiplier * hidden_dim)
    return multiple_of * ((hidden_dim + multiple_of - 1) // multiple_of)


def _reference_mlp(x, w_fc, w_fc2, w_proj):
    x1 = jnp.einsum("btd,dh->bth", x, w_fc)
    x2 = jnp.einsum("btd,dh->bth", x, w_fc2)
    return jnp.einsum("bth,hd->btd", x1 * (x2 * jax.nn.sigmoid(x2)), w_proj)


if __name__ == "__main__":
    # Small config consistent with the module's __init__.
    n_embd = 64
    multiple_of = 128
    ffn_dim_multiplier = None
    hidden_dim = _llama_hidden_dim(n_embd, multiple_of, ffn_dim_multiplier)  # 256

    B, T = 2, 8

    key = jax.random.PRNGKey(0)
    k_x, k1, k2, k3 = jax.random.split(key, 4)

    x = jax.random.normal(k_x, (B, T, n_embd), dtype=jnp.float32)
    # Parameters stored as (in, out) = PyTorch weight.T.
    w_fc = (jax.random.normal(k1, (n_embd, hidden_dim), dtype=jnp.float32)
            / jnp.sqrt(n_embd))
    w_fc2 = (jax.random.normal(k2, (n_embd, hidden_dim), dtype=jnp.float32)
             / jnp.sqrt(n_embd))
    w_proj = (jax.random.normal(k3, (hidden_dim, n_embd), dtype=jnp.float32)
              / jnp.sqrt(hidden_dim))

    ref = _reference_mlp(x, w_fc, w_fc2, w_proj)

    # --- f32 path, small tiles that still exercise the multi-step
    #     (parallel M, arbitrary H-accumulation) grid ----------------------
    out_f32 = swiglu_mlp(x, w_fc, w_fc2, w_proj, tile_m=8, tile_h=128,
                         compute_dtype=jnp.float32)
    out_f32 = jax.block_until_ready(out_f32)
    assert out_f32.shape == (B, T, n_embd)
    assert jnp.allclose(out_f32, ref, atol=1e-4, rtol=1e-4), "f32 mismatch"

    # --- bf16 path (MXU-native), weights pre-cast once (production path) --
    wg_b, wu_b, wd_b = prepare_mlp_weights(w_fc, w_fc2, w_proj, jnp.bfloat16)
    out_bf16 = swiglu_mlp(x.astype(jnp.bfloat16), wg_b, wu_b, wd_b,
                          tile_m=8, tile_h=128,
                          compute_dtype=jnp.bfloat16, out_dtype=jnp.float32)
    out_bf16 = jax.block_until_ready(out_bf16)
    to_bf = lambda a: a.astype(jnp.bfloat16).astype(jnp.float32)
    ref_bf = _reference_mlp(to_bf(x), to_bf(w_fc), to_bf(w_fc2), to_bf(w_proj))
    assert out_bf16.shape == (B, T, n_embd)
    assert jnp.allclose(out_bf16, ref_bf, atol=1e-1, rtol=1e-1), "bf16 mismatch"

    # --- auto-tiled path (per-generation defaults, clamped to this tiny M) -
    out_auto = swiglu_mlp(x, w_fc, w_fc2, w_proj, compute_dtype=jnp.float32)
    out_auto = jax.block_until_ready(out_auto)
    assert jnp.allclose(out_auto, ref, atol=1e-4, rtol=1e-4), "auto-tile mismatch"

    print("KERNEL_OK")
</pallas_src>

<mosaic_0001>
module attributes {stable_mosaic.version = 11 : i64} {
  func.func @_swiglu_mlp_kernel(%arg0: i32, %arg1: i32, %arg2: memref<8x64xf32, #tpu.memory_space<vmem>>, %arg3: memref<64x128xf32, #tpu.memory_space<vmem>>, %arg4: memref<64x128xf32, #tpu.memory_space<vmem>>, %arg5: memref<128x64xf32, #tpu.memory_space<vmem>>, %arg6: memref<8x64xf32, #tpu.memory_space<vmem>>, %arg7: memref<8x64xf32, #tpu.memory_space<vmem>>) attributes {dimension_semantics = [#tpu.dimension_semantics<parallel>, #tpu.dimension_semantics<arbitrary>], iteration_bounds = array<i64: 2, 2>, scalar_prefetch = 0 : i64, scratch_operands = 1 : i64, tpu.core_type = #tpu.core_type<tc>, window_params = [{transform_indices = @transform_0, window_bounds = array<i64: 8, 64>}, {transform_indices = @transform_1, window_bounds = array<i64: 64, 128>}, {transform_indices = @transform_2, window_bounds = array<i64: 64, 128>}, {transform_indices = @transform_3, window_bounds = array<i64: 128, 64>}, {transform_indices = @transform_4, window_bounds = array<i64: 8, 64>}]} {
    %c0_i32 = arith.constant 0 : i32
    %0 = arith.cmpi eq, %arg1, %c0_i32 : i32
    %1 = arith.extui %0 : i1 to i32
    %c0_i32_0 = arith.constant 0 : i32
    %2 = arith.cmpi ne, %1, %c0_i32_0 : i32
    scf.if %2 {
      %cst_16 = arith.constant 0.000000e+00 : f32
      %23 = vector.broadcast %cst_16 : f32 to vector<8x64xf32>
      %c0_17 = arith.constant 0 : index
      %c0_18 = arith.constant 0 : index
      %24 = vector.load %arg7[%c0_17, %c0_18] : memref<8x64xf32, #tpu.memory_space<vmem>>, vector<8x64xf32>
      tpu.vector_store %arg7[%c0_17, %c0_18], %23 {strides = array<i32>} : memref<8x64xf32, #tpu.memory_space<vmem>>, vector<8x64xf32>,
    } else {
    }
    %c0 = arith.constant 0 : index
    %c0_1 = arith.constant 0 : index
    %3 = vector.load %arg2[%c0, %c0_1] : memref<8x64xf32, #tpu.memory_space<vmem>>, vector<8x64xf32>
    %c0_2 = arith.constant 0 : index
    %c0_3 = arith.constant 0 : index
    %4 = vector.load %arg3[%c0_2, %c0_3] : memref<64x128xf32, #tpu.memory_space<vmem>>, vector<64x128xf32>
    %cst = arith.constant dense<0.000000e+00> : vector<8x128xf32>
    %5 = tpu.matmul %3, %4, %cst {dimension_numbers = #tpu.dot_dimension_numbers<[1], [0], [0], [1], [0, 0, 1, 1], [], []>} : vector<8x64xf32>, vector<64x128xf32>, vector<8x128xf32> -> vector<8x128xf32>
    %c0_4 = arith.constant 0 : index
    %c0_5 = arith.constant 0 : index
    %6 = vector.load %arg4[%c0_4, %c0_5] : memref<64x128xf32, #tpu.memory_space<vmem>>, vector<64x128xf32>
    %cst_6 = arith.constant dense<0.000000e+00> : vector<8x128xf32>
    %7 = tpu.matmul %3, %6, %cst_6 {dimension_numbers = #tpu.dot_dimension_numbers<[1], [0], [0], [1], [0, 0, 1, 1], [], []>} : vector<8x64xf32>, vector<64x128xf32>, vector<8x128xf32> -> vector<8x128xf32>
    %8 = arith.negf %7 : vector<8x128xf32>
    %9 = math.exp %8 : vector<8x128xf32>
    %cst_7 = arith.constant 1.000000e+00 : f32
    %10 = vector.broadcast %cst_7 : f32 to vector<8x128xf32>
    %11 = arith.addf %10, %9 : vector<8x128xf32>
    %12 = arith.divf %10, %11 : vector<8x128xf32>
    %13 = arith.mulf %7, %12 : vector<8x128xf32>
    %14 = arith.mulf %5, %13 : vector<8x128xf32>
    %c0_8 = arith.constant 0 : index
    %c0_9 = arith.constant 0 : index
    %15 = vector.load %arg7[%c0_8, %c0_9] : memref<8x64xf32, #tpu.memory_space<vmem>>, vector<8x64xf32>
    %c0_10 = arith.constant 0 : index
    %c0_11 = arith.constant 0 : index
    %16 = vector.load %arg5[%c0_10, %c0_11] : memref<128x64xf32, #tpu.memory_space<vmem>>, vector<128x64xf32>
    %cst_12 = arith.constant dense<0.000000e+00> : vector<8x64xf32>
    %17 = tpu.matmul %14, %16, %cst_12 {dimension_numbers = #tpu.dot_dimension_numbers<[1], [0], [0], [1], [0, 0, 1, 1], [], []>} : vector<8x128xf32>, vector<128x64xf32>, vector<8x64xf32> -> vector<8x64xf32>
    %18 = arith.addf %15, %17 : vector<8x64xf32>
    %c0_13 = arith.constant 0 : index
    %c0_14 = arith.constant 0 : index
    %19 = vector.load %arg7[%c0_13, %c0_14] : memref<8x64xf32, #tpu.memory_space<vmem>>, vector<8x64xf32>
    tpu.vector_store %arg7[%c0_13, %c0_14], %18 {strides = array<i32>} : memref<8x64xf32, #tpu.memory_space<vmem>>, vector<8x64xf32>,
    %c1_i32 = arith.constant 1 : i32
    %20 = arith.cmpi eq, %arg1, %c1_i32 : i32
    %21 = arith.extui %20 : i1 to i32
    %c0_i32_15 = arith.constant 0 : i32
    %22 = arith.cmpi ne, %21, %c0_i32_15 : i32
    scf.if %22 {
      %c0_16 = arith.constant 0 : index
      %c0_17 = arith.constant 0 : index
      %23 = vector.load %arg7[%c0_16, %c0_17] : memref<8x64xf32, #tpu.memory_space<vmem>>, vector<8x64xf32>
      %c0_18 = arith.constant 0 : index
      %c0_19 = arith.constant 0 : index
      %24 = vector.load %arg6[%c0_18, %c0_19] : memref<8x64xf32, #tpu.memory_space<vmem>>, vector<8x64xf32>
      tpu.vector_store %arg6[%c0_18, %c0_19], %23 {strides = array<i32>} : memref<8x64xf32, #tpu.memory_space<vmem>>, vector<8x64xf32>,
    } else {
    }
    return
  }
  func.func @transform_0(%arg0: i32, %arg1: i32) -> (i32, i32) {
    %c0_i32 = arith.constant 0 : i32
    %c0_i32_0 = arith.constant 0 : i32
    return %arg0, %c0_i32 : i32, i32
  }
  func.func @transform_1(%arg0: i32, %arg1: i32) -> (i32, i32) {
    %c0_i32 = arith.constant 0 : i32
    %c0_i32_0 = arith.constant 0 : i32
    return %c0_i32, %arg1 : i32, i32
  }
  func.func @transform_2(%arg0: i32, %arg1: i32) -> (i32, i32) {
    %c0_i32 = arith.constant 0 : i32
    %c0_i32_0 = arith.constant 0 : i32
    return %c0_i32, %arg1 : i32, i32
  }
  func.func @transform_3(%arg0: i32, %arg1: i32) -> (i32, i32) {
    %c0_i32 = arith.constant 0 : i32
    %c0_i32_0 = arith.constant 0 : i32
    return %arg1, %c0_i32 : i32, i32
  }
  func.func @transform_4(%arg0: i32, %arg1: i32) -> (i32, i32) {
    %c0_i32 = arith.constant 0 : i32
    %c0_i32_0 = arith.constant 0 : i32
    return %arg0, %c0_i32 : i32, i32
  }
}

</mosaic_0001>

<bundles_post_ra>
// kernel: tpu_custom_call.1
= control target key start
LH: loop header
LB: loop body
LE: loop exit
PB: predicated region body
PF: predicated region fallthrough
CT: control target
= control target key end

     0   :  { %s1452_s0 = inlined_call_operand.vmem [shape: f32[16,64], index: 0, kind: input, shape index: {}]   ;;  %s1453_s1 = inlined_call_operand.vmem [shape: f32[64,256], index: 1, kind: input, shape index: {}]   ;;  %s1454_s2 = inlined_call_operand.vmem [shape: f32[64,256], index: 2, kind: input, shape index: {}]   ;;  %s1455_s3 = inlined_call_operand.vmem [shape: f32[256,64], index: 3, kind: input, shape index: {}]   ;;  %s1456_s4 = inlined_call_operand.hbm [shape: f32[16,64], index: 4, kind: output, shape index: {}]  }
   0x1   :  { %1460 = sst [smem:[#allocation10_spill]] %s1453_s1 }
   0x2   :  { %1461 = sst [smem:[#allocation11_spill]] %s1454_s2 }
   0x3   :  { %9 = vsyncpa [#allocation6], 0 }
   0x4   :  { %11 = vsyncpa [#allocation6 + $0x1], 0  ;;  %s1210_s15 = smov 0   ;;  %s1212_s16 = smov 0  }
   0x5   :  { %s1214_s17 = smov 0   ;;  %s1216_s18 = smov 0  }
   0x6   :  { %s1218_s19 = smov 0   ;;  %s1220_s20 = smov 0  }
   0x7   :  { %s1222_s21 = smov 0   ;;  %s1224_s22 = smov 0  }
   0x8   :  { %s1226_s23 = smov 0   ;;  %s1228_s24 = smov 0  }
   0x9 LB: > { %s793_s25 = sadd.s32 4294967295, %s1178_s24   ;;  %s794_s26 = sadd.s32 4294967294, %s1178_s24   ;;  %s1178_s24 = sphi %s1228_s24, %s17_s24   ;;  %s1174_s23 = sphi %s1226_s23, %s1480_s23   ;;  %s1170_s22 = sphi %s1224_s22, %s1479_s22   ;;  %s1166_s21 = sphi %s1222_s21, %s1478_s21   ;;  %s1162_s20 = sphi %s1220_s20, %s1477_s20   ;;  %s1158_s19 = sphi %s1218_s19, %s1476_s19   ;;  %s1154_s18 = sphi %s1216_s18, %s1475_s18   ;;  %s1150_s17 = sphi %s1214_s17, %s1474_s17   ;;  %s1146_s16 = sphi %s1212_s16, %s1473_s16   ;;  %s1142_s15 = sphi %s1210_s15, %s1472_s15  }
   0xa   : > { %s26_s27 = sadd.s32 1, %s1170_s22  ;;  %s29_s28 = sadd.s32 1, %s1174_s23 }
   0xb   : > { %p27_p0 = scmp.ge.s32.totalorder %s26_s27, 2  ;;  %s62_s29 = sadd.s32 1, %s1158_s19 }
   0xc   : > { %p69_p1 = scmp.ne.s32.totalorder %s1158_s19, %s1154_s18  ;;  %p70_p2 = scmp.eq.s32.totalorder %s1178_s24, 0 }
   0xd   : > { %s1482_s27 = smov (%p27_p0, %s26_s27), 0  ;;  %s1484_s28 = smov (!%p27_p0, %s29_s28), %s1174_s23 }
   0xe   : > { %1462 = sst [smem:[#allocation8_spill]] %s1482_s27  ;;  %s59_s30 = ssub.s32 %s1170_s22, %s1482_s27 }
   0xf   : > { %p1273_p3 = por %p70_p2, %p69_p1  ;;  %p31_p4 = scmp.ge.s32.totalorder %s1484_s28, 2 }
  0x10   : > { %p60_p5 = scmp.eq.s32.totalorder %s59_s30, 0  ;;  %s140_s6 = sadd.s32 1, %s1150_s17 }
  0x11   : > { %p150_p6 = scmp.ne.s32.totalorder %s1150_s17, %s1146_s16  ;;  %s1486_s28 = smov (%p31_p4, %s1484_s28), 0 }
  0x12   : > { %1464 = sst [smem:[#allocation9_spill]] %s1486_s28  ;;  %s137_s8 = ssub.s32 %s1174_s23, %s1486_s28 }
  0x13   : > { %s1283_s7 = scalar_select %p60_p5, %s1158_s19, %s62_s29  }
  0x14   : > { %p151_p7 = scmp.eq.s32.totalorder %s793_s25, 3  ;;  %p138_p8 = scmp.eq.s32.totalorder %s137_s8, 0 }
  0x15   : > { %p156_p9 = scmp.ne.s32.totalorder %s1146_s16, %s1142_s15  ;;  %p157_p11 = scmp.eq.s32.totalorder %s794_s26, 3 }
  0x16   : > { %p1289_p10 = por %p151_p7, %p150_p6  ;;  %p796_p13 = scmp.ge.s32.totalorder %s1178_s24, 4 }
  0x17   : > { %s1294_s10 = scalar_select %p138_p8, %s1150_s17, %s140_s6  }
  0x18   : > { %p1296_p12 = por %p157_p11, %p156_p9  ;;  %173 = sbr.rel (%p796_p13) target bundleno = 59 (0x3b), region = 16 }
  0x1f   : > { %183 = sbr.rel (!%p1273_p3) target bundleno = 45 (0x2d), region = 24  ;;  %s185_s12 = sand.u32 (%p1273_p3), 1, %s1158_s19  }
  0x20   : > { %s798_s13 = sshll.u32 (%p1273_p3), %s1170_s22, 3  ;;  %s797_s14 = sshll.u32 (%p1273_p3), %s185_s12, 6 }
  0x21   : > { %s1467_s1 = sld [smem:[#allocation10_spill]] (%p1273_p3)  ;;  %s187_s30 = scalar_lea.vmem (%p1273_p3), [#allocation3], %s797_s14 }
  0x27   : > { %s189_s26 = scalar_lea.vmem %s1467_s1, %s798_s13 }
  0x28   : > { %v231_v0 = vld [vmem:[%s189_s26] sm:$0xff]  ;;  %v233_v1 = vld [vmem:[%s189_s26 + $0x10] sm:$0xff] }
  0x29   : > { %v235_v2 = vld [vmem:[%s189_s26 + $0x20] sm:$0xff]  ;;  %232 = vst [vmem:[%s187_s30] sm:$0xff] %v231_v0  ;;  %234 = vst [vmem:[%s187_s30 + $0x8] sm:$0xff] %v233_v1  ;;  %v237_v3 = vld [vmem:[%s189_s26 + $0x30] sm:$0xff] }
  0x2a   : > { %236 = vst [vmem:[%s187_s30 + $0x10] sm:$0xff] %v235_v2  ;;  %v239_v4 = vld [vmem:[%s189_s26 + $0x40] sm:$0xff]  ;;  %v241_v5 = vld [vmem:[%s189_s26 + $0x50] sm:$0xff]  ;;  %238 = vst [vmem:[%s187_s30 + $0x18] sm:$0xff] %v237_v3 }
  0x2b   : > { %240 = vst [vmem:[%s187_s30 + $0x20] sm:$0xff] %v239_v4  ;;  %242 = vst [vmem:[%s187_s30 + $0x28] sm:$0xff] %v241_v5  ;;  %v243_v6 = vld [vmem:[%s189_s26 + $0x60] sm:$0xff]  ;;  %v245_v7 = vld [vmem:[%s189_s26 + $0x70] sm:$0xff] }
  0x2c   : > { %244 = vst [vmem:[%s187_s30 + $0x30] sm:$0xff] %v243_v6  ;;  %246 = vst [vmem:[%s187_s30 + $0x38] sm:$0xff] %v245_v7 }
  0x2d PF: > { %252 = sbr.rel (!%p1273_p3) target bundleno = 59 (0x3b), region = 62  ;;  %s254_s6 = sand.u32 (%p1273_p3), 1, %s1158_s19  }
  0x2e   : > { %s800_s8 = sshll.u32 (%p1273_p3), %s1170_s22, 3  ;;  %s799_s12 = sshll.u32 (%p1273_p3), %s254_s6, 6 }
  0x2f   : > { %s1468_s2 = sld [smem:[#allocation11_spill]] (%p1273_p3)  ;;  %s256_s29 = scalar_lea.vmem (%p1273_p3), [#allocation4], %s799_s12 }
  0x35   : > { %s258_s25 = scalar_lea.vmem %s1468_s2, %s800_s8 }
  0x36   : > { %v300_v8 = vld [vmem:[%s258_s25] sm:$0xff]  ;;  %v302_v9 = vld [vmem:[%s258_s25 + $0x10] sm:$0xff] }
  0x37   : > { %v304_v10 = vld [vmem:[%s258_s25 + $0x20] sm:$0xff]  ;;  %301 = vst [vmem:[%s256_s29] sm:$0xff] %v300_v8  ;;  %303 = vst [vmem:[%s256_s29 + $0x8] sm:$0xff] %v302_v9  ;;  %v306_v11 = vld [vmem:[%s258_s25 + $0x30] sm:$0xff] }
  0x38   : > { %305 = vst [vmem:[%s256_s29 + $0x10] sm:$0xff] %v304_v10  ;;  %v308_v12 = vld [vmem:[%s258_s25 + $0x40] sm:$0xff]  ;;  %v310_v13 = vld [vmem:[%s258_s25 + $0x50] sm:$0xff]  ;;  %307 = vst [vmem:[%s256_s29 + $0x18] sm:$0xff] %v306_v11 }
  0x39   : > { %309 = vst [vmem:[%s256_s29 + $0x20] sm:$0xff] %v308_v12  ;;  %311 = vst [vmem:[%s256_s29 + $0x28] sm:$0xff] %v310_v13  ;;  %v312_v14 = vld [vmem:[%s258_s25 + $0x60] sm:$0xff]  ;;  %v314_v15 = vld [vmem:[%s258_s25 + $0x70] sm:$0xff] }
  0x3a   : > { %313 = vst [vmem:[%s256_s29 + $0x30] sm:$0xff] %v312_v14  ;;  %315 = vst [vmem:[%s256_s29 + $0x38] sm:$0xff] %v314_v15 }
  0x3b PF: > { %p801_p0 = scmp.ge.s32.totalorder %s1178_s24, 1  ;;  %p329_p1 = scmp.lt.s32.totalorder %s1178_s24, 5 }
  0x3d   : > { %p330_p2 = pnand %p801_p0, %p329_p1 }
  0x3e   : > { %s336_s5 = sand.u32 (!%p330_p2), 1, %s1154_s18   ;;  %s1457_s26 = sand.u32 (!%p330_p2), 1, %s1146_s16  }
  0x3f   : > { %333 = sbr.rel (%p330_p2) target bundleno = 602 (0x25a), region = 104  ;;  %s802_s30 = sshll.u32 (!%p330_p2), %s336_s5, 6 }
  0x40   : > { %s1321_s6 = sshll.u32 (!%p330_p2), %s1457_s26, 3  ;;  %p381_p3 = scmp.lt.s32.totalorder (!%p330_p2), %s1166_s21, 1 }
  0x41   : > { %s806_s8 = sshll.u32 (!%p330_p2), %s1162_s20, 4  ;;  %s338_s26 = scalar_lea.vmem (!%p330_p2), [#allocation3], %s802_s30 }
  0x42   : > { %p386_p4 = scmp.lt.s32.totalorder (!%p330_p2), %s806_s8, 31  ;;  %s1336_s28 = scalar_lea.vmem (!%p330_p2), [#allocation4], %s802_s30 }
  0x43   : > { %s380_s27 = scalar_lea.vmem (!%p330_p2), [#allocation5], %s1321_s6  ;;  %p808_p5 = scmp.ne.s32.totalorder (!%p330_p2), %s1162_s20, 0 }
  0x46   : > { %s382_s12 = scalar_select %p381_p3, %s1166_s21, 1 }
  0x47   : > { %s1488_s8 = smov (!%p386_p4, %s806_s8), 31  ;;  %394 = sbr.rel (%p808_p5) target bundleno = 78 (0x4e), region = 116 }
  0x48   : > { %s805_s13 = sshll.u32 %s382_s12, 3  ;;  %s807_s1 = sshll.u32 %s1488_s8, 3  ;;  %vm395_vm0 = vcmask (!%p808_p5), 523264   ;;  %v1180_v16 = vmov (!%p808_p5), 0.0  }
  0x49   : > { %s1329_s29 = scalar_lea.vmem %s1452_s0, %s805_s13  ;;  %s1334_s5 = scalar_lea.vmem %s1455_s3, %s807_s1  ;;  %396 = vst.msk [vmem:[#allocation2] sm:$0xff] (!%p808_p5), %vm395_vm0, %v1180_v16 }
  0x4e PF: > { %v398_v17 = vld [vmem:[%s338_s26] sm:$0xff]  ;;  %v399_v18 = vld [vmem:[%s338_s26 + $0x8] sm:$0xff]  ;;  %v400_v19 = vld [vmem:[%s338_s26 + $0x10] sm:$0xff]  ;;  %v1181_v20 = vmov 0.0|0.0   ;;  %vm1182_vm1 = vmmov 0   ;;  %v1183_v23 = vmov 0.0  }
  0x4f   : > { %925 = vmatprep.subr.bf16.mxu1 %v1181_v20  ;;  %v926_v21 = vpack.c.bf16 %v399_v18, %v398_v17  ;;  %v401_v22 = vld [vmem:[%s338_s26 + $0x18] sm:$0xff]  ;;  %868 = vmatprep.mubr.msk.f32.mxu1 %vm1182_vm1, %v1183_v23  ;;  %v402_v25 = vld [vmem:[%s338_s26 + $0x20] sm:$0xff]  ;;  %v403_v26 = vld [vmem:[%s338_s26 + $0x28] sm:$0xff]  ;;  %vm406_vm2 = vcmask 523264   ;;  %p812_p6 = scmp.ne.s32.totalorder %s1162_s20, 1 }
  0x50   : > { %949 = vmatprep.subr.bf16.mxu0 %v1181_v20  ;;  %922 = vmatprep.mubr.msk.f32.mxu0 %vm1182_vm1, %v1183_v23  ;;  %v929_v24 = vpack.c.bf16 %v401_v22, %v400_v19  ;;  %v932_v27 = vpack.c.bf16 %v403_v26, %v402_v25  ;;  %v404_v28 = vld [vmem:[%s338_s26 + $0x30] sm:$0xff]  ;;  %v405_v29 = vld [vmem:[%s338_s26 + $0x38] sm:$0xff]  ;;  %v480_v31 = vld [vmem:[%s1336_s28] sm:$0xff] }
  0x51   : > { %927 = vmatpush3.bf16.msra.mxu1 %v926_v21  ;;  %v935_v30 = vpack.c.bf16 %v405_v29, %v404_v28  ;;  %v481_v32 = vld [vmem:[%s1336_s28 + $0x8] sm:$0xff]  ;;  %v397_v33 = vld [vmem:[%s1329_s29] sm:$0xff]  ;;  %v482_v35 = vld [vmem:[%s1336_s28 + $0x10] sm:$0xff] }
  0x52   : > { %928 = vmatprep.subr.bf16.mxu1 %v1181_v20  ;;  %v938_v34 = vpack.c.bf16 %v481_v32, %v480_v31  ;;  %v483_v36 = vld [vmem:[%s1336_s28 + $0x18] sm:$0xff]  ;;  %v484_v38 = vld [vmem:[%s1336_s28 + $0x20] sm:$0xff]  ;;  %v485_v39 = vld [vmem:[%s1336_s28 + $0x28] sm:$0xff] }
  0x53   : > { %v941_v37 = vpack.c.bf16 %v483_v36, %v482_v35  ;;  %v944_v40 = vpack.c.bf16 %v485_v39, %v484_v38  ;;  %v486_v41 = vld [vmem:[%s1336_s28 + $0x30] sm:$0xff]  ;;  %v487_v42 = vld [vmem:[%s1336_s28 + $0x38] sm:$0xff]  ;;  %v568_v45 = vld [vmem:[%s1334_s5 + $0x8] sm:$0xff] }
  0x54   : > { %v947_v43 = vpack.c.bf16 %v487_v42, %v486_v41  ;;  %v567_v44 = vld [vmem:[%s1334_s5] sm:$0xff]  ;;  %v569_v47 = vld [vmem:[%s1334_s5 + $0x10] sm:$0xff]  ;;  %v570_v48 = vld [vmem:[%s1334_s5 + $0x18] sm:$0xff] }
  0x55   : > { %930 = vmatpush3.bf16.msra.mxu1 %v929_v24  ;;  %v950_v46 = vpack.c.bf16 %v568_v45, %v567_v44  ;;  %v953_v49 = vpack.c.bf16 %v570_v48, %v569_v47  ;;  %v571_v50 = vld [vmem:[%s1334_s5 + $0x20] sm:$0xff]  ;;  %v572_v51 = vld [vmem:[%s1334_s5 + $0x28] sm:$0xff]  ;;  %v573_v53 = vld [vmem:[%s1334_s5 + $0x30] sm:$0xff] }
  0x56   : > { %931 = vmatprep.subr.bf16.mxu1 %v1181_v20  ;;  %v956_v52 = vpack.c.bf16 %v572_v51, %v571_v50  ;;  %v574_v54 = vld [vmem:[%s1334_s5 + $0x38] sm:$0xff]  ;;  %v575_v56 = vld [vmem:[%s1334_s5 + $0x40] sm:$0xff]  ;;  %v576_v57 = vld [vmem:[%s1334_s5 + $0x48] sm:$0xff] }
  0x57   : > { %951 = vmatpush3.bf16.msra.mxu0 %v950_v46  ;;  %v959_v55 = vpack.c.bf16 %v574_v54, %v573_v53  ;;  %v962_v58 = vpack.c.bf16 %v576_v57, %v575_v56  ;;  %v577_v59 = vld [vmem:[%s1334_s5 + $0x50] sm:$0xff]  ;;  %v578_v60 = vld [vmem:[%s1334_s5 + $0x58] sm:$0xff]  ;;  %v579_v62 = vld [vmem:[%s1334_s5 + $0x60] sm:$0xff] }
  0x58   : > { %952 = vmatprep.subr.bf16.mxu0 %v1181_v20  ;;  %v965_v61 = vpack.c.bf16 %v578_v60, %v577_v59  ;;  %v580_v63 = vld [vmem:[%s1334_s5 + $0x68] sm:$0xff]  ;;  %v581_v1 = vld [vmem:[%s1334_s5 + $0x70] sm:$0xff]  ;;  %v582_v2 = vld [vmem:[%s1334_s5 + $0x78] sm:$0xff] }
  0x59   : > { %933 = vmatpush3.bf16.msra.mxu1 %v932_v27  ;;  %v968_v0 = vpack.c.bf16 %v580_v63, %v579_v62  ;;  %v971_v3 = vpack.c.bf16 %v582_v2, %v581_v1  ;;  %v566_v14 = vld [vmem:[#allocation2] sm:$0xff] }
  0x5a   : > { %934 = vmatprep.subr.bf16.mxu1 %v1181_v20 }
  0x5b   : > { %954 = vmatpush3.bf16.msra.mxu0 %v953_v49 }
  0x5c   : > { %955 = vmatprep.subr.bf16.mxu0 %v1181_v20 }
  0x5d   : > { %936 = vmatpush3.bf16.msra.mxu1 %v935_v30 }
  0x5e   : > { %937 = vmatprep.subr.bf16.mxu1 %v1181_v20 }
  0x5f   : > { %957 = vmatpush3.bf16.msra.mxu0 %v956_v52 }
  0x60   : > { %869 = vmatmul.mubr.msk.f32.vlgmr.msra.gmra.mrb[0].mxu1 %vm406_vm2, %v397_v33  ;;  %958 = vmatprep.subr.bf16.mxu0 %v1181_v20 }
  0x61   : > { %939 = vmatpush3.bf16.msra.mxu1 %v938_v34  ;;  %887 = vmatprep.mubr.msk.f32.mxu1 %vm1182_vm1, %v1183_v23 }
  0x62   : > { %940 = vmatprep.subr.bf16.mxu1 %v1181_v20 }
  0x63   : > { %960 = vmatpush3.bf16.msra.mxu0 %v959_v55 }
  0x64   : > { %961 = vmatprep.subr.bf16.mxu0 %v1181_v20 }
  0x65   : > { %942 = vmatpush3.bf16.msra.mxu1 %v941_v37 }
  0x66   : > { %943 = vmatprep.subr.bf16.mxu1 %v1181_v20 }
  0x67   : > { %963 = vmatpush3.bf16.msra.mxu0 %v962_v58 }
  0x68   : > { %964 = vmatprep.subr.bf16.mxu0 %v1181_v20 }
  0x69   : > { %945 = vmatpush3.bf16.msra.mxu1 %v944_v40 }
  0x6a   : > { %946 = vmatprep.subr.bf16.mxu1 %v1181_v20 }
  0x6b   : > { %966 = vmatpush3.bf16.msra.mxu0 %v965_v61 }
  0x6c   : > { %967 = vmatprep.subr.bf16.mxu0 %v1181_v20 }
  0x6d   : > { %948 = vmatpush3.bf16.msra.mxu1 %v947_v43 }
  0x6f   : > { %969 = vmatpush3.bf16.msra.mxu0 %v968_v0 }
  0x70   : > { %888 = vmatmul.mubr.msk.f32.vlgmr.msra.gmra.mrb[2].mxu1 %vm406_vm2, %v397_v33  ;;  %970 = vmatprep.subr.bf16.mxu0 %v1181_v20 }
  0x73   : > { %972 = vmatpush3.bf16.msra.mxu0 %v971_v3 }
 0x133   : > { %v476_v4 = vpop.f32.mrb[0].mxu1 }
 0x134   : > { %v870_v5 = vpop.f32.mrb[1].mxu1 }
 0x143   : > { %v554_v6 = vpop.f32.mrb[2].mxu1 }
 0x144   : > { %v811_v7 = vmul.f32 -1.442695, %v554_v6  ;;  %v889_v8 = vpop.f32.mrb[3].mxu1 }
 0x146   : > { %1064 = vpow2.f32 %v811_v7 }
 0x150   : > { %v1065_v9 = vpop.eup %1064 }
 0x151   : > { %v561_v10 = vadd.f32 1.0, %v1065_v9 }
 0x153   : > { %1066 = vrcp.f32 %v561_v10 }
 0x15d   : > { %v1067_v11 = vpop.eup %1066 }
 0x15e   : > { %v564_v12 = vmul.f32 %v1067_v11, %v554_v6 }
 0x160   : > { %v565_v13 = vmul.f32 %v564_v12, %v476_v4 }
 0x162   : > { %923 = vmatmul.mubr.f32.vlgmr.msra.gmra.mrb[0].mxu0 %v565_v13 }
 0x232   : > { %658 = sbr.rel (%p812_p6) target bundleno = 577 (0x241), region = 120 }
 0x235   : > { %v649_v15 = vpop.f32.mrb[0].mxu0 }
 0x236   : > { %v653_v16 = vadd.f32 %v649_v15, %v566_v14  ;;  %v924_v17 = vpop.f32.mrb[1].mxu0 }
 0x238   : > { %654 = vst.msk [vmem:[#allocation2] sm:$0xff] %vm406_vm2, %v653_v16 }
 0x23f   : > { %v659_v18 = vld [vmem:[#allocation2] sm:$0xff] }
 0x240   : > { %660 = vst.msk [vmem:[%s380_s27] sm:$0xff] %vm406_vm2, %v659_v18 }
 0x241 PF: > { %s814_s1 = sshll.u32 %s1166_s21, 7  ;;  %s675_s30 = sshll.u32 %s380_s27, 4  ;;  %s676_s30 = int_to_ptr.vmem [resolvable:$true] %s675_s30 }
 0x242   : > { %s1395_s26 = scalar_lea.hbm %s1456_s4, %s814_s1  ;;  %s1469_s20 = sand.u32 1, %s1146_s16  }
 0x243   : > { %s662_s8 = scalar_lea.sflag [#allocation6], %s1469_s20  ;;  %s1068_s12 = scalar_lea.vmem %s676_s30, 128 }
 0x244   : > { %p1069_p7 = scmp.ne.s32.totalorder %s676_s30, %s1068_s12  ;;  %s1184_s13 = smov [#allocation5]  }
 0x245   : > { %s1072_s14 = sshll.u32 %s1184_s13, 4  ;;  %s1073_s14 = int_to_ptr.vmem [resolvable:$false] %s1072_s14 }
 0x246   : > { %p1070_p8 = pnand %p1069_p7, %p1289_p10  ;;  %s1074_s25 = scalar_lea.vmem %s1073_s14, 256 }
 0x247   : > { %p1075_p11 = scmp.lt.s32.totalorder %s676_s30, %s1073_s14  ;;  %p1076_p13 = scmp.lt.s32.totalorder %s1074_s25, %s1068_s12 }
 0x248   : > { %p1071_p9 = pneg %p1070_p8 }
 0x249   : > { %p1077_p0 = por %p1076_p13, %p1075_p11 }
 0x24b   : > { %p1078_p1 = pnand %p1077_p0, %p1071_p9 }
 0x24d   : > { %1081 = shalt.err (!%p1078_p1)
}
 0x24e   : > { %s1082_s21 = scalar_lea.hbm %s1395_s26, 128  ;;  %s1086_s29 = scalar_lea.hbm %s1456_s4, 256 }
 0x24f   : > { %p1083_p2 = scmp.ne.s32.totalorder %s1395_s26, %s1082_s21  ;;  %p1087_p5 = scmp.lt.u32.totalorder %s1395_s26, %s1456_s4 }
 0x250   : > { %p1088_p6 = scmp.lt.u32.totalorder %s1086_s29, %s1082_s21  ;;  %p1090_p8 = scmp.lt.u32.totalorder %s1082_s21, %s1395_s26 }
 0x251   : > { %p1084_p3 = pnand %p1083_p2, %p1289_p10 }
 0x252   : > { %p1089_p7 = por %p1088_p6, %p1087_p5 }
 0x253   : > { %p1085_p4 = pneg %p1084_p3 }
 0x254   : > { %p1091_p9 = por %p1090_p8, %p1089_p7 }
 0x256   : > { %p1092_p11 = pnand %p1091_p9, %p1085_p4 }
 0x258   : > { %1095 = shalt.err (!%p1092_p11)
}
 0x259   : > { %973 = dma.vmem_to_hbm [thread:$0]  (%p1289_p10), %s676_s30, 128, %s1395_s26, %s662_s8  }
 0x25a PF: > { %p979_p13 = scmp.ge.s32.totalorder %s1178_s24, 2  ;;  %s687_s1 = sand.u32 1, %s1142_s15  }
 0x25b   : > { %s688_s2 = scalar_lea.sflag [#allocation6], %s687_s1 }
 0x25c   : > { %p976_p0 = pnand %p979_p13, %p1296_p12 }
 0x25e   : > { %1137 = dma.done.wait (!%p976_p0), %s688_s2, 128  }
 0x25f   : > { %1139 = vsyncadd (!%p976_p0), %s688_s2, 4294967168  ;;  %s17_s24 = sadd.s32 1, %s1178_s24   ;;  %s1470_s9 = sld [smem:[#allocation8_spill]] }
 0x260   : > { %p14_p1 = scmp.ge.s32.totalorder %s17_s24, 6   ;;  %s1471_s28 = sld [smem:[#allocation9_spill]] }
 0x261   : > { %s1472_s15 = smov %s1146_s16  ;;  %s1473_s16 = smov %s1150_s17 }
 0x262   : > { %s1474_s17 = smov %s1294_s10  ;;  %s1475_s18 = smov %s1158_s19 }
 0x263   : > { %s1476_s19 = smov %s1283_s7  ;;  %s1477_s20 = smov %s1170_s22 }
 0x264   : > { %s1478_s21 = smov %s1174_s23  ;;  %16 = sbr.rel (!%p14_p1) target bundleno = 9 (0x9), region = 174 }
 0x265   : > { %s1479_s22 = smov %s1470_s9 }
 0x266   : > { %s1480_s23 = smov %s1471_s28 }
 0x26b   :  { %693 = vsyncpa [#allocation6], 1 }
 0x26c   :  { %695 = vsyncpa [#allocation6 + $0x1], 1 }

</bundles_post_ra>
